<compile_context>
chip_gen: v7x
topology: tpu7x:2x2x1
jax: 0.10.0
libtpu: 0.0.40
codegen_flags: <defaults>
</compile_context>

<pallas_src>
import math
import functools

import jax
import jax.numpy as jnp
import numpy as np
from jax.experimental import pallas as pl
from jax.experimental.pallas import tpu as pltpu

# ---------------- model config (small, consistent with the module) ---------
BATCH = 2
SEQ_Q = 8
SEQ_K = 8
HIDDEN = 32
NUM_HEADS = 4
HEAD_DIM = HIDDEN // NUM_HEADS
IS_CAUSAL = True  # exercise the causal branch too


# ---------------- Pallas kernel --------------------------------------------
def _mha_kernel(q_in_ref, k_in_ref, v_in_ref, mask_ref,
                wqkv_ref, bqkv_ref, wo_ref, bo_ref,
                out_ref, *attn_refs,
                num_heads, head_dim, is_causal, return_attention):
    nh, d = num_heads, head_dim
    bb, sq, hid = q_in_ref.shape
    sk = k_in_ref.shape[1]
    nq = bb * sq
    nk = bb * sk

    # ---- fused QKV projection: one MXU push on batch-folded rows ----------
    xq = q_in_ref[...].reshape(nq, hid)
    xk = k_in_ref[...].reshape(nk, hid)
    xv = v_in_ref[...].reshape(nk, hid)
    x_all = jnp.concatenate([xq, xk, xv], axis=0)            # (nq+2nk, H)
    y = jnp.dot(x_all, wqkv_ref[...],
                preferred_element_type=jnp.float32) + bqkv_ref[...]
    q = y[:nq, 0:hid]                                        # xq @ Wq + bq
    k = y[nq:nq + nk, hid:2 * hid]                           # xk @ Wk + bk
    v = y[nq + nk:, 2 * hid:3 * hid]                         # xv @ Wv + bv

    # ---- split heads onto a leading (non-lane) batch axis: (bb*nh, S, d) ---
    def split_heads(x2, s):
        x3 = x2.reshape(bb, s, hid)
        parts = [x3[:, :, h * d:(h + 1) * d] for h in range(nh)]
        return jnp.stack(parts, axis=1).reshape(bb * nh, s, d)

    qh = split_heads(q, sq)
    kh = split_heads(k, sk)
    vh = split_heads(v, sk)

    # ---- scaled dot-product attention, all heads batched -------------------
    scale = jnp.float32(1.0 / math.sqrt(d))
    scores = jnp.einsum('nqd,nkd->nqk', qh, kh,
                        preferred_element_type=jnp.float32) * scale

    # additive attention mask, broadcast over heads once
    bias = jnp.broadcast_to(mask_ref[...], (bb, nh, sq, sk))
    scores = scores + bias.reshape(bb * nh, sq, sk)

    if is_causal:
        # computed once (hoisted out of any per-head work)
        row = jax.lax.broadcasted_iota(jnp.int32, (sq, sk), 0)
        col = jax.lax.broadcasted_iota(jnp.int32, (sq, sk), 1)
        causal = (col > row)[None, :, :]
        # masked_fill_ semantics: replace with -10000.0 where col > row
        scores = jnp.where(causal, jnp.float32(-10000.0), scores)

    # softmax over the key axis (exact reciprocal keeps 1e-5 tolerance)
    m = jnp.max(scores, axis=-1, keepdims=True)
    e = jnp.exp(scores - m)
    p = e * pl.reciprocal(jnp.sum(e, axis=-1, keepdims=True), approx=False)

    # ---- context + output projection ---------------------------------------
    ctx = jnp.einsum('nqk,nkd->nqd', p, vh,
                     preferred_element_type=jnp.float32)     # (bb*nh, sq, d)
    ctx4 = ctx.reshape(bb, nh, sq, d)
    ctx_m = jnp.concatenate([ctx4[:, h] for h in range(nh)], axis=-1)  # (bb,sq,H)
    out = jnp.dot(ctx_m.reshape(nq, hid), wo_ref[...],
                  preferred_element_type=jnp.float32) + bo_ref[...]
    out_ref[...] = out.reshape(bb, sq, hid).astype(out_ref.dtype)      # 1 store

    if return_attention:
        # single store of all heads' weights (no per-head partial stores)
        attn_refs[0][...] = p.reshape(bb, nh, sq, sk).astype(attn_refs[0].dtype)


# ---------------- wrapper ----------------------------------------------------
def multihead_attention(query, key, value, params, attention_mask=None, *,
                        num_heads=NUM_HEADS, is_causal=IS_CAUSAL,
                        return_attention=False, batch_block=None):
    """query/key/value: [B, S, H] float32. Returns (output, attn_or_None)."""
    B, Sq, H = query.shape
    Sk = key.shape[1]
    head_dim = H // num_heads

    if attention_mask is None:
        attention_mask = jnp.zeros((B, 1, Sq, Sk), jnp.float32)

    # PyTorch Linear weight is [out, in]; kernel expects [in, out].
    # Fused QKV weight [H, 3H] = [Wq^T | Wk^T | Wv^T], fused bias [1, 3H].
    wqkv = jnp.concatenate(
        [params["wq"].T, params["wk"].T, params["wv"].T], axis=1)
    bqkv = jnp.concatenate(
        [params["bq"], params["bk"], params["bv"]]).reshape(1, 3 * H)
    wo = params["wo"].T
    bo = params["bo"].reshape(1, H)

    # One grid step covers the whole (small) batch; for larger B, batch_block
    # keeps a "parallel" grid axis so multi-TC chips (v7x) can split the work.
    bb = B if batch_block is None else batch_block
    assert B % bb == 0, "batch_block must divide batch"
    grid = (B // bb,)

    kernel = functools.partial(_mha_kernel, num_heads=num_heads,
                               head_dim=head_dim, is_causal=is_causal,
                               return_attention=return_attention)

    rep = lambda shape: pl.BlockSpec(shape, lambda i: (0,) * len(shape))

    in_specs = [
        pl.BlockSpec((bb, Sq, H), lambda i: (i, 0, 0)),          # query
        pl.BlockSpec((bb, Sk, H), lambda i: (i, 0, 0)),          # key
        pl.BlockSpec((bb, Sk, H), lambda i: (i, 0, 0)),          # value
        pl.BlockSpec((bb, 1, Sq, Sk), lambda i: (i, 0, 0, 0)),   # additive mask
        rep((H, 3 * H)), rep((1, 3 * H)),                        # fused Wqkv, bqkv
        rep((H, H)), rep((1, H)),                                # Wo, bo
    ]
    out_shape = [jax.ShapeDtypeStruct((B, Sq, H), jnp.float32)]
    out_specs = [pl.BlockSpec((bb, Sq, H), lambda i: (i, 0, 0))]
    if return_attention:
        out_shape.append(
            jax.ShapeDtypeStruct((B, num_heads, Sq, Sk), jnp.float32))
        out_specs.append(
            pl.BlockSpec((bb, num_heads, Sq, Sk), lambda i: (i, 0, 0, 0)))

    results = pl.pallas_call(
        kernel,
        out_shape=tuple(out_shape),
        grid_spec=pltpu.PrefetchScalarGridSpec(
            num_scalar_prefetch=0,
            grid=grid,
            in_specs=in_specs,
            out_specs=out_specs,
        ),
        compiler_params=pltpu.CompilerParams(
            dimension_semantics=("parallel",)),
    )(query, key, value, attention_mask, wqkv, bqkv, wo, bo)

    if return_attention:
        return results[0], results[1]
    return results[0], None


# ---------------- deterministic parameter init (xavier_uniform, zero bias) --
def xavier_uniform(key, out_dim, in_dim, gain):
    bound = gain * math.sqrt(6.0 / (in_dim + out_dim))
    return jax.random.uniform(key, (out_dim, in_dim), jnp.float32,
                              minval=-bound, maxval=bound)


def make_params(key, hidden):
    k1, k2, k3, k4 = jax.random.split(key, 4)
    return {
        "wq": xavier_uniform(k1, hidden, hidden, 1.0 / math.sqrt(2.0)),
        "wk": xavier_uniform(k2, hidden, hidden, 1.0 / math.sqrt(2.0)),
        "wv": xavier_uniform(k3, hidden, hidden, 1.0),
        "wo": xavier_uniform(k4, hidden, hidden, 1.0),
        "bq": jnp.zeros((hidden,), jnp.float32),
        "bk": jnp.zeros((hidden,), jnp.float32),
        "bv": jnp.zeros((hidden,), jnp.float32),
        "bo": jnp.zeros((hidden,), jnp.float32),
    }


# ---------------- pure-JAX reference (mirrors the PyTorch forward) ----------
def reference(query, key, value, params, attention_mask, num_heads, is_causal):
    B, Sq, H = query.shape
    Sk = key.shape[1]
    d = H // num_heads
    q = query @ params["wq"].T + params["bq"]
    k = key @ params["wk"].T + params["bk"]
    v = value @ params["wv"].T + params["bv"]
    q = q.reshape(B, Sq, num_heads, d).transpose(0, 2, 1, 3)
    k = k.reshape(B, Sk, num_heads, d).transpose(0, 2, 1, 3)
    v = v.reshape(B, Sk, num_heads, d).transpose(0, 2, 1, 3)
    scores = jnp.einsum("bhqd,bhkd->bhqk", q, k) / math.sqrt(d)
    scores = scores + attention_mask
    if is_causal:
        causal = jnp.triu(jnp.ones((Sq, Sk), bool), k=1)
        scores = jnp.where(causal[None, None], -10000.0, scores)
    attn = jax.nn.softmax(scores, axis=-1)
    ctx = jnp.einsum("bhqk,bhkd->bhqd", attn, v)
    ctx = ctx.transpose(0, 2, 1, 3).reshape(B, Sq, H)
    out = ctx @ params["wo"].T + params["bo"]
    return out, attn


if __name__ == "__main__":
    root = jax.random.PRNGKey(0)
    kp, kq, kk, kv, km = jax.random.split(root, 5)

    params = make_params(kp, HIDDEN)
    query = jax.random.normal(kq, (BATCH, SEQ_Q, HIDDEN), jnp.float32)
    key = jax.random.normal(kk, (BATCH, SEQ_K, HIDDEN), jnp.float32)
    value = jax.random.normal(kv, (BATCH, SEQ_K, HIDDEN), jnp.float32)
    # additive attention mask [B, 1, Sq, Sk] (0 = attend, -1e4 = masked)
    mask_bits = jax.random.bernoulli(km, 0.1, (BATCH, 1, SEQ_Q, SEQ_K))
    attention_mask = jnp.where(mask_bits, -10000.0, 0.0).astype(jnp.float32)

    ref_out, ref_attn = reference(query, key, value, params, attention_mask,
                                  NUM_HEADS, IS_CAUSAL)

    # path 1: with attention-weight output (validates both tensors)
    out, attn = multihead_attention(query, key, value, params, attention_mask,
                                    return_attention=True)
    out = jax.block_until_ready(out)
    attn = jax.block_until_ready(attn)
    np.testing.assert_allclose(np.asarray(out), np.asarray(ref_out),
                               rtol=1e-5, atol=1e-5)
    np.testing.assert_allclose(np.asarray(attn), np.asarray(ref_attn),
                               rtol=1e-5, atol=1e-5)

    # path 2: fast path without attention-weight writeback (PyTorch default)
    out2, attn2 = multihead_attention(query, key, value, params, attention_mask,
                                      return_attention=False)
    out2 = jax.block_until_ready(out2)
    assert attn2 is None
    np.testing.assert_allclose(np.asarray(out2), np.asarray(ref_out),
                               rtol=1e-5, atol=1e-5)

    print("KERNEL_OK")
</pallas_src>

<mosaic_0001>
module attributes {stable_mosaic.version = 11 : i64} {
  func.func @_mha_kernel(%arg0: i32, %arg1: memref<2x8x32xf32, #tpu.memory_space<vmem>>, %arg2: memref<2x8x32xf32, #tpu.memory_space<vmem>>, %arg3: memref<2x8x32xf32, #tpu.memory_space<vmem>>, %arg4: memref<2x1x8x8xf32, #tpu.memory_space<vmem>>, %arg5: memref<32x96xf32, #tpu.memory_space<vmem>>, %arg6: memref<1x96xf32, #tpu.memory_space<vmem>>, %arg7: memref<32x32xf32, #tpu.memory_space<vmem>>, %arg8: memref<1x32xf32, #tpu.memory_space<vmem>>, %arg9: memref<2x8x32xf32, #tpu.memory_space<vmem>>, %arg10: memref<2x4x8x8xf32, #tpu.memory_space<vmem>>) attributes {dimension_semantics = [#tpu.dimension_semantics<parallel>], iteration_bounds = array<i64: 1>, scalar_prefetch = 0 : i64, scratch_operands = 0 : i64, tpu.core_type = #tpu.core_type<tc>, window_params = [{transform_indices = @transform_0, window_bounds = array<i64: 2, 8, 32>}, {transform_indices = @transform_1, window_bounds = array<i64: 2, 8, 32>}, {transform_indices = @transform_2, window_bounds = array<i64: 2, 8, 32>}, {transform_indices = @transform_3, window_bounds = array<i64: 2, 1, 8, 8>}, {pipeline_mode = #tpu.pipeline_mode<synchronous>, transform_indices = @transform_4, window_bounds = array<i64: 32, 96>}, {pipeline_mode = #tpu.pipeline_mode<synchronous>, transform_indices = @transform_5, window_bounds = array<i64: 1, 96>}, {pipeline_mode = #tpu.pipeline_mode<synchronous>, transform_indices = @transform_6, window_bounds = array<i64: 32, 32>}, {pipeline_mode = #tpu.pipeline_mode<synchronous>, transform_indices = @transform_7, window_bounds = array<i64: 1, 32>}, {transform_indices = @transform_8, window_bounds = array<i64: 2, 8, 32>}, {transform_indices = @transform_9, window_bounds = array<i64: 2, 4, 8, 8>}]} {
    %c0 = arith.constant 0 : index
    %c0_0 = arith.constant 0 : index
    %c0_1 = arith.constant 0 : index
    %0 = vector.load %arg1[%c0, %c0_0, %c0_1] : memref<2x8x32xf32, #tpu.memory_space<vmem>>, vector<2x8x32xf32>
    %1 = vector.shape_cast %0 : vector<2x8x32xf32> to vector<16x32xf32>
    %c0_2 = arith.constant 0 : index
    %c0_3 = arith.constant 0 : index
    %c0_4 = arith.constant 0 : index
    %2 = vector.load %arg2[%c0_2, %c0_3, %c0_4] : memref<2x8x32xf32, #tpu.memory_space<vmem>>, vector<2x8x32xf32>
    %3 = vector.shape_cast %2 : vector<2x8x32xf32> to vector<16x32xf32>
    %c0_5 = arith.constant 0 : index
    %c0_6 = arith.constant 0 : index
    %c0_7 = arith.constant 0 : index
    %4 = vector.load %arg3[%c0_5, %c0_6, %c0_7] : memref<2x8x32xf32, #tpu.memory_space<vmem>>, vector<2x8x32xf32>
    %5 = vector.shape_cast %4 : vector<2x8x32xf32> to vector<16x32xf32>
    %6 = tpu.concatenate %1, %3, %5 in 0 : vector<16x32xf32>, vector<16x32xf32>, vector<16x32xf32> -> vector<48x32xf32>
    %c0_8 = arith.constant 0 : index
    %c0_9 = arith.constant 0 : index
    %7 = vector.load %arg5[%c0_8, %c0_9] : memref<32x96xf32, #tpu.memory_space<vmem>>, vector<32x96xf32>
    %cst = arith.constant dense<0.000000e+00> : vector<48x96xf32>
    %8 = tpu.matmul %6, %7, %cst {dimension_numbers = #tpu.dot_dimension_numbers<[1], [0], [0], [1], [0, 0, 1, 1], [], []>} : vector<48x32xf32>, vector<32x96xf32>, vector<48x96xf32> -> vector<48x96xf32>
    %c0_10 = arith.constant 0 : index
    %c0_11 = arith.constant 0 : index
    %9 = vector.load %arg6[%c0_10, %c0_11] : memref<1x96xf32, #tpu.memory_space<vmem>>, vector<1x96xf32>
    %10 = vector.broadcast %9 : vector<1x96xf32> to vector<48x96xf32>
    %11 = arith.addf %8, %10 : vector<48x96xf32>
    %12 = vector.extract_strided_slice %11 {offsets = [0, 0], sizes = [16, 32], strides = [1, 1]} : vector<48x96xf32> to vector<16x32xf32>
    %13 = vector.extract_strided_slice %11 {offsets = [16, 32], sizes = [16, 32], strides = [1, 1]} : vector<48x96xf32> to vector<16x32xf32>
    %14 = vector.extract_strided_slice %11 {offsets = [32, 64], sizes = [16, 32], strides = [1, 1]} : vector<48x96xf32> to vector<16x32xf32>
    %15 = vector.shape_cast %12 : vector<16x32xf32> to vector<2x8x32xf32>
    %16 = vector.extract_strided_slice %15 {offsets = [0, 0, 0], sizes = [2, 8, 8], strides = [1, 1, 1]} : vector<2x8x32xf32> to vector<2x8x8xf32>
    %17 = vector.extract_strided_slice %15 {offsets = [0, 0, 8], sizes = [2, 8, 8], strides = [1, 1, 1]} : vector<2x8x32xf32> to vector<2x8x8xf32>
    %18 = vector.extract_strided_slice %15 {offsets = [0, 0, 16], sizes = [2, 8, 8], strides = [1, 1, 1]} : vector<2x8x32xf32> to vector<2x8x8xf32>
    %19 = vector.extract_strided_slice %15 {offsets = [0, 0, 24], sizes = [2, 8, 8], strides = [1, 1, 1]} : vector<2x8x32xf32> to vector<2x8x8xf32>
    %20 = vector.shape_cast %16 : vector<2x8x8xf32> to vector<2x1x8x8xf32>
    %21 = vector.shape_cast %17 : vector<2x8x8xf32> to vector<2x1x8x8xf32>
    %22 = vector.shape_cast %18 : vector<2x8x8xf32> to vector<2x1x8x8xf32>
    %23 = vector.shape_cast %19 : vector<2x8x8xf32> to vector<2x1x8x8xf32>
    %24 = tpu.concatenate %20, %21, %22, %23 in 1 : vector<2x1x8x8xf32>, vector<2x1x8x8xf32>, vector<2x1x8x8xf32>, vector<2x1x8x8xf32> -> vector<2x4x8x8xf32>
    %25 = vector.shape_cast %24 : vector<2x4x8x8xf32> to vector<8x8x8xf32>
    %26 = vector.shape_cast %13 : vector<16x32xf32> to vector<2x8x32xf32>
    %27 = vector.extract_strided_slice %26 {offsets = [0, 0, 0], sizes = [2, 8, 8], strides = [1, 1, 1]} : vector<2x8x32xf32> to vector<2x8x8xf32>
    %28 = vector.extract_strided_slice %26 {offsets = [0, 0, 8], sizes = [2, 8, 8], strides = [1, 1, 1]} : vector<2x8x32xf32> to vector<2x8x8xf32>
    %29 = vector.extract_strided_slice %26 {offsets = [0, 0, 16], sizes = [2, 8, 8], strides = [1, 1, 1]} : vector<2x8x32xf32> to vector<2x8x8xf32>
    %30 = vector.extract_strided_slice %26 {offsets = [0, 0, 24], sizes = [2, 8, 8], strides = [1, 1, 1]} : vector<2x8x32xf32> to vector<2x8x8xf32>
    %31 = vector.shape_cast %27 : vector<2x8x8xf32> to vector<2x1x8x8xf32>
    %32 = vector.shape_cast %28 : vector<2x8x8xf32> to vector<2x1x8x8xf32>
    %33 = vector.shape_cast %29 : vector<2x8x8xf32> to vector<2x1x8x8xf32>
    %34 = vector.shape_cast %30 : vector<2x8x8xf32> to vector<2x1x8x8xf32>
    %35 = tpu.concatenate %31, %32, %33, %34 in 1 : vector<2x1x8x8xf32>, vector<2x1x8x8xf32>, vector<2x1x8x8xf32>, vector<2x1x8x8xf32> -> vector<2x4x8x8xf32>
    %36 = vector.shape_cast %35 : vector<2x4x8x8xf32> to vector<8x8x8xf32>
    %37 = vector.shape_cast %14 : vector<16x32xf32> to vector<2x8x32xf32>
    %38 = vector.extract_strided_slice %37 {offsets = [0, 0, 0], sizes = [2, 8, 8], strides = [1, 1, 1]} : vector<2x8x32xf32> to vector<2x8x8xf32>
    %39 = vector.extract_strided_slice %37 {offsets = [0, 0, 8], sizes = [2, 8, 8], strides = [1, 1, 1]} : vector<2x8x32xf32> to vector<2x8x8xf32>
    %40 = vector.extract_strided_slice %37 {offsets = [0, 0, 16], sizes = [2, 8, 8], strides = [1, 1, 1]} : vector<2x8x32xf32> to vector<2x8x8xf32>
    %41 = vector.extract_strided_slice %37 {offsets = [0, 0, 24], sizes = [2, 8, 8], strides = [1, 1, 1]} : vector<2x8x32xf32> to vector<2x8x8xf32>
    %42 = vector.shape_cast %38 : vector<2x8x8xf32> to vector<2x1x8x8xf32>
    %43 = vector.shape_cast %39 : vector<2x8x8xf32> to vector<2x1x8x8xf32>
    %44 = vector.shape_cast %40 : vector<2x8x8xf32> to vector<2x1x8x8xf32>
    %45 = vector.shape_cast %41 : vector<2x8x8xf32> to vector<2x1x8x8xf32>
    %46 = tpu.concatenate %42, %43, %44, %45 in 1 : vector<2x1x8x8xf32>, vector<2x1x8x8xf32>, vector<2x1x8x8xf32>, vector<2x1x8x8xf32> -> vector<2x4x8x8xf32>
    %47 = vector.shape_cast %46 : vector<2x4x8x8xf32> to vector<8x8x8xf32>
    "tpu.trace_start"() <{level = 10 : i32, message = "nqd,nkd->nqk"}> : () -> ()
    %cst_12 = arith.constant dense<0.000000e+00> : vector<8x8x8xf32>
    %48 = tpu.matmul %25, %36, %cst_12 {dimension_numbers = #tpu.dot_dimension_numbers<[2], [2], [1], [1], [0, 0, 0, 1, 1, 1], [0], [0]>} : vector<8x8x8xf32>, vector<8x8x8xf32>, vector<8x8x8xf32> -> vector<8x8x8xf32>
    "tpu.trace_stop"() : () -> ()
    %cst_13 = arith.constant 0.353553385 : f32
    %49 = vector.broadcast %cst_13 : f32 to vector<8x8x8xf32>
    %50 = arith.mulf %48, %49 : vector<8x8x8xf32>
    %c0_14 = arith.constant 0 : index
    %c0_15 = arith.constant 0 : index
    %c0_16 = arith.constant 0 : index
    %c0_17 = arith.constant 0 : index
    %51 = vector.load %arg4[%c0_14, %c0_15, %c0_16, %c0_17] : memref<2x1x8x8xf32, #tpu.memory_space<vmem>>, vector<2x1x8x8xf32>
    %52 = vector.shape_cast %51 : vector<2x1x8x8xf32> to vector<2x1x8x8xf32>
    %53 = vector.broadcast %52 : vector<2x1x8x8xf32> to vector<2x4x8x8xf32>
    %54 = vector.shape_cast %53 : vector<2x4x8x8xf32> to vector<8x8x8xf32>
    %55 = arith.addf %50, %54 : vector<8x8x8xf32>
    %56 = tpu.iota {dimensions = array<i32: 0>} : vector<8x8xi32>
    %57 = tpu.iota {dimensions = array<i32: 1>} : vector<8x8xi32>
    %58 = arith.cmpi sgt, %57, %56 : vector<8x8xi32>
    %59 = vector.shape_cast %58 : vector<8x8xi1> to vector<1x8x8xi1>
    %cst_18 = arith.constant -1.000000e+04 : f32
    %60 = vector.shape_cast %59 : vector<1x8x8xi1> to vector<1x8x8xi1>
    %61 = vector.broadcast %60 : vector<1x8x8xi1> to vector<8x8x8xi1>
    %62 = vector.broadcast %cst_18 : f32 to vector<8x8x8xf32>
    %63 = arith.select %61, %62, %55 : vector<8x8x8xi1>, vector<8x8x8xf32>
    %cst_19 = arith.constant dense<0xFF800000> : vector<8x8xf32>
    %64 = vector.multi_reduction <maximumf>, %63, %cst_19 [2] : vector<8x8x8xf32> to vector<8x8xf32>
    %65 = vector.shape_cast %64 : vector<8x8xf32> to vector<8x8x1xf32>
    %66 = vector.broadcast %65 : vector<8x8x1xf32> to vector<8x8x8xf32>
    %67 = arith.subf %63, %66 : vector<8x8x8xf32>
    %68 = math.exp %67 : vector<8x8x8xf32>
    %cst_20 = arith.constant dense<0.000000e+00> : vector<8x8xf32>
    %69 = vector.multi_reduction <add>, %68, %cst_20 [2] : vector<8x8x8xf32> to vector<8x8xf32>
    %70 = vector.shape_cast %69 : vector<8x8xf32> to vector<8x8x1xf32>
    %71 = tpu.reciprocal %70 : vector<8x8x1xf32> -> vector<8x8x1xf32>
    %72 = vector.broadcast %71 : vector<8x8x1xf32> to vector<8x8x8xf32>
    %73 = arith.mulf %68, %72 : vector<8x8x8xf32>
    "tpu.trace_start"() <{level = 10 : i32, message = "nqk,nkd->nqd"}> : () -> ()
    %cst_21 = arith.constant dense<0.000000e+00> : vector<8x8x8xf32>
    %74 = tpu.matmul %73, %47, %cst_21 {dimension_numbers = #tpu.dot_dimension_numbers<[2], [1], [1], [2], [0, 0, 0, 1, 1, 2], [0], [0]>} : vector<8x8x8xf32>, vector<8x8x8xf32>, vector<8x8x8xf32> -> vector<8x8x8xf32>
    "tpu.trace_stop"() : () -> ()
    %75 = vector.shape_cast %74 : vector<8x8x8xf32> to vector<2x4x8x8xf32>
    %76 = vector.extract_strided_slice %75 {offsets = [0, 0, 0, 0], sizes = [2, 1, 8, 8], strides = [1, 1, 1, 1]} : vector<2x4x8x8xf32> to vector<2x1x8x8xf32>
    %77 = vector.shape_cast %76 : vector<2x1x8x8xf32> to vector<2x8x8xf32>
    %78 = vector.extract_strided_slice %75 {offsets = [0, 1, 0, 0], sizes = [2, 1, 8, 8], strides = [1, 1, 1, 1]} : vector<2x4x8x8xf32> to vector<2x1x8x8xf32>
    %79 = vector.shape_cast %78 : vector<2x1x8x8xf32> to vector<2x8x8xf32>
    %80 = vector.extract_strided_slice %75 {offsets = [0, 2, 0, 0], sizes = [2, 1, 8, 8], strides = [1, 1, 1, 1]} : vector<2x4x8x8xf32> to vector<2x1x8x8xf32>
    %81 = vector.shape_cast %80 : vector<2x1x8x8xf32> to vector<2x8x8xf32>
    %82 = vector.extract_strided_slice %75 {offsets = [0, 3, 0, 0], sizes = [2, 1, 8, 8], strides = [1, 1, 1, 1]} : vector<2x4x8x8xf32> to vector<2x1x8x8xf32>
    %83 = vector.shape_cast %82 : vector<2x1x8x8xf32> to vector<2x8x8xf32>
    %84 = tpu.concatenate %77, %79, %81, %83 in 2 : vector<2x8x8xf32>, vector<2x8x8xf32>, vector<2x8x8xf32>, vector<2x8x8xf32> -> vector<2x8x32xf32>
    %85 = vector.shape_cast %84 : vector<2x8x32xf32> to vector<16x32xf32>
    %c0_22 = arith.constant 0 : index
    %c0_23 = arith.constant 0 : index
    %86 = vector.load %arg7[%c0_22, %c0_23] : memref<32x32xf32, #tpu.memory_space<vmem>>, vector<32x32xf32>
    %cst_24 = arith.constant dense<0.000000e+00> : vector<16x32xf32>
    %87 = tpu.matmul %85, %86, %cst_24 {dimension_numbers = #tpu.dot_dimension_numbers<[1], [0], [0], [1], [0, 0, 1, 1], [], []>} : vector<16x32xf32>, vector<32x32xf32>, vector<16x32xf32> -> vector<16x32xf32>
    %c0_25 = arith.constant 0 : index
    %c0_26 = arith.constant 0 : index
    %88 = vector.load %arg8[%c0_25, %c0_26] : memref<1x32xf32, #tpu.memory_space<vmem>>, vector<1x32xf32>
    %89 = vector.broadcast %88 : vector<1x32xf32> to vector<16x32xf32>
    %90 = arith.addf %87, %89 : vector<16x32xf32>
    %91 = vector.shape_cast %90 : vector<16x32xf32> to vector<2x8x32xf32>
    %c0_27 = arith.constant 0 : index
    %c0_28 = arith.constant 0 : index
    %c0_29 = arith.constant 0 : index
    %92 = vector.load %arg9[%c0_27, %c0_28, %c0_29] : memref<2x8x32xf32, #tpu.memory_space<vmem>>, vector<2x8x32xf32>
    tpu.vector_store %arg9[%c0_27, %c0_28, %c0_29], %91 {strides = array<i32>} : memref<2x8x32xf32, #tpu.memory_space<vmem>>, vector<2x8x32xf32>,
    %93 = vector.shape_cast %73 : vector<8x8x8xf32> to vector<2x4x8x8xf32>
    %c0_30 = arith.constant 0 : index
    %c0_31 = arith.constant 0 : index
    %c0_32 = arith.constant 0 : index
    %c0_33 = arith.constant 0 : index
    %94 = vector.load %arg10[%c0_30, %c0_31, %c0_32, %c0_33] : memref<2x4x8x8xf32, #tpu.memory_space<vmem>>, vector<2x4x8x8xf32>
    tpu.vector_store %arg10[%c0_30, %c0_31, %c0_32, %c0_33], %93 {strides = array<i32>} : memref<2x4x8x8xf32, #tpu.memory_space<vmem>>, vector<2x4x8x8xf32>,
    return
  }
  func.func @transform_0(%arg0: i32) -> (i32, i32, i32) {
    %c0_i32 = arith.constant 0 : i32
    %c0_i32_0 = arith.constant 0 : i32
    %c0_i32_1 = arith.constant 0 : i32
    return %arg0, %c0_i32, %c0_i32_0 : i32, i32, i32
  }
  func.func @transform_1(%arg0: i32) -> (i32, i32, i32) {
    %c0_i32 = arith.constant 0 : i32
    %c0_i32_0 = arith.constant 0 : i32
    %c0_i32_1 = arith.constant 0 : i32
    return %arg0, %c0_i32, %c0_i32_0 : i32, i32, i32
  }
  func.func @transform_2(%arg0: i32) -> (i32, i32, i32) {
    %c0_i32 = arith.constant 0 : i32
    %c0_i32_0 = arith.constant 0 : i32
    %c0_i32_1 = arith.constant 0 : i32
    return %arg0, %c0_i32, %c0_i32_0 : i32, i32, i32
  }
  func.func @transform_3(%arg0: i32) -> (i32, i32, i32, i32) {
    %c0_i32 = arith.constant 0 : i32
    %c0_i32_0 = arith.constant 0 : i32
    %c0_i32_1 = arith.constant 0 : i32
    %c0_i32_2 = arith.constant 0 : i32
    return %arg0, %c0_i32, %c0_i32_0, %c0_i32_1 : i32, i32, i32, i32
  }
  func.func @transform_4(%arg0: i32) -> (i32, i32) {
    %c0_i32 = arith.constant 0 : i32
    %c0_i32_0 = arith.constant 0 : i32
    %c0_i32_1 = arith.constant 0 : i32
    return %c0_i32, %c0_i32_0 : i32, i32
  }
  func.func @transform_5(%arg0: i32) -> (i32, i32) {
    %c0_i32 = arith.constant 0 : i32
    %c0_i32_0 = arith.constant 0 : i32
    %c0_i32_1 = arith.constant 0 : i32
    return %c0_i32, %c0_i32_0 : i32, i32
  }
  func.func @transform_6(%arg0: i32) -> (i32, i32) {
    %c0_i32 = arith.constant 0 : i32
    %c0_i32_0 = arith.constant 0 : i32
    %c0_i32_1 = arith.constant 0 : i32
    return %c0_i32, %c0_i32_0 : i32, i32
  }
  func.func @transform_7(%arg0: i32) -> (i32, i32) {
    %c0_i32 = arith.constant 0 : i32
    %c0_i32_0 = arith.constant 0 : i32
    %c0_i32_1 = arith.constant 0 : i32
    return %c0_i32, %c0_i32_0 : i32, i32
  }
  func.func @transform_8(%arg0: i32) -> (i32, i32, i32) {
    %c0_i32 = arith.constant 0 : i32
    %c0_i32_0 = arith.constant 0 : i32
    %c0_i32_1 = arith.constant 0 : i32
    return %arg0, %c0_i32, %c0_i32_0 : i32, i32, i32
  }
  func.func @transform_9(%arg0: i32) -> (i32, i32, i32, i32) {
    %c0_i32 = arith.constant 0 : i32
    %c0_i32_0 = arith.constant 0 : i32
    %c0_i32_1 = arith.constant 0 : i32
    %c0_i32_2 = arith.constant 0 : i32
    return %arg0, %c0_i32, %c0_i32_0, %c0_i32_1 : i32, i32, i32, i32
  }
}

</mosaic_0001>

<bundles_post_ra>
// kernel: tpu_custom_call.1
= control target key start
LH: loop header
LB: loop body
LE: loop exit
PB: predicated region body
PF: predicated region fallthrough
CT: control target
= control target key end

     0   :  { %15 = vsyncpa [#allocation3], 0  ;;  %s2667_s0 = inlined_call_operand.hbm [shape: f32[2,8,32], index: 0, kind: input, shape index: {}]   ;;  %s2668_s1 = inlined_call_operand.hbm [shape: f32[2,8,32], index: 1, kind: input, shape index: {}]   ;;  %s2669_s2 = inlined_call_operand.hbm [shape: f32[2,8,32], index: 2, kind: input, shape index: {}]   ;;  %s2670_s3 = inlined_call_operand.hbm [shape: f32[2,1,8,8], index: 3, kind: input, shape index: {}]   ;;  %s2671_s4 = inlined_call_operand.hbm [shape: f32[32,96], index: 4, kind: input, shape index: {}]   ;;  %s2672_s5 = inlined_call_operand.vmem [shape: f32[1,96], index: 5, kind: input, shape index: {}]   ;;  %s2673_s6 = inlined_call_operand.hbm [shape: f32[32,32], index: 6, kind: input, shape index: {}]   ;;  %s2674_s7 = inlined_call_operand.vmem [shape: f32[1,32], index: 7, kind: input, shape index: {}]   ;;  %s2675_s8 = inlined_call_operand.hbm [shape: f32[2,8,32], index: 8, kind: output, shape index: {0}]   ;;  %s2676_s9 = inlined_call_operand.hbm [shape: f32[2,4,8,8], index: 9, kind: output, shape index: {1}]  }
   0x1   :  { %16 = vsyncpa [#allocation6], 0 }
   0x2   :  { %17 = vsyncpa [#allocation9], 0 }
   0x3   :  { %18 = vsyncpa [#allocation12], 0 }
   0x4   :  { %19 = vsyncpa [#allocation4], 0 }
   0x5   :  { %20 = vsyncpa [#allocation15], 0  ;;  %s2241_s30 = smov [#allocation5]   ;;  %s2242_s11 = smov [#allocation8]  }
   0x6   :  { %s38_s10 = sshll.u32 %s2241_s30, 4  ;;  %s62_s12 = sshll.u32 %s2242_s11, 4  ;;  %s39_s10 = int_to_ptr.vmem [resolvable:$true] %s38_s10  ;;  %s2310_s12 = int_to_ptr.vmem [resolvable:$true] %s62_s12 }
   0x7   :  { %s2053_s15 = scalar_lea.hbm %s2668_s1, 256 }
   0x8   :  { %p2054_p0 = scmp.ne.s32.totalorder %s2668_s1, %s2053_s15  ;;  %p2057_p1 = scmp.lt.u32.totalorder %s2053_s15, %s2668_s1 }
   0xa   :  { %p2059_p2 = pnand %p2057_p1, %p2054_p0 }
   0xc   :  { %2062 = shalt.err (!%p2059_p2)
}
   0xd   :  { %s2063_s20 = scalar_lea.vmem %s39_s10, 256  ;;  %p2068_p4 = scmp.lt.s32.totalorder %s39_s10, %s39_s10 }
   0xe   :  { %p2064_p3 = scmp.ne.s32.totalorder %s39_s10, %s2063_s20  ;;  %p2069_p5 = scmp.lt.s32.totalorder %s2063_s20, %s2063_s20 }
  0x10   :  { %p2070_p6 = por %p2069_p5, %p2068_p4 }
  0x12   :  { %p2071_p7 = pnand %p2070_p6, %p2064_p3 }
  0x14   :  { %2074 = shalt.err (!%p2071_p7)
}
  0x15   :  { %s2243_s21 = smov 128   ;;  %s2244_s22 = smov 8  }
  0x16   :  { %44 = dma.hbm_to_vmem [thread:$0]  %s2668_s1, 256, %s39_s10, [#allocation6], %s2243_s21, %s2243_s21, %s2244_s22  }
  0x17   :  { %s2075_s27 = scalar_lea.hbm %s2670_s3, 256 }
  0x18   :  { %p2076_p8 = scmp.ne.s32.totalorder %s2670_s3, %s2075_s27  ;;  %p2079_p9 = scmp.lt.u32.totalorder %s2075_s27, %s2670_s3 }
  0x1a   :  { %p2081_p10 = pnand %p2079_p9, %p2076_p8 }
  0x1c   :  { %2084 = shalt.err (!%p2081_p10)
}
  0x1d   :  { %s2085_s13 = scalar_lea.vmem %s2310_s12, 256  ;;  %p2090_p12 = scmp.lt.s32.totalorder %s2310_s12, %s2310_s12 }
  0x1e   :  { %p2086_p11 = scmp.ne.s32.totalorder %s2310_s12, %s2085_s13  ;;  %p2091_p13 = scmp.lt.s32.totalorder %s2085_s13, %s2085_s13 }
  0x20   :  { %p2092_p0 = por %p2091_p13, %p2090_p12 }
  0x22   :  { %p2093_p1 = pnand %p2092_p0, %p2086_p11 }
  0x24   :  { %2096 = shalt.err (!%p2093_p1)
}
  0x25   :  { %68 = dma.hbm_to_vmem [thread:$0]  %s2670_s3, 256, %s2310_s12, [#allocation9], %s2243_s21, %s2243_s21, %s2244_s22  }
  0x26   :  { %s2245_s14 = smov [#allocation2]   ;;  %s2246_s16 = smov [#allocation7]  }
  0x27   :  { %s26_s15 = sshll.u32 %s2245_s14, 4  ;;  %s50_s17 = sshll.u32 %s2246_s16, 4  ;;  %s27_s15 = int_to_ptr.vmem [resolvable:$true] %s26_s15  ;;  %s2347_s17 = int_to_ptr.vmem [resolvable:$true] %s50_s17 }
  0x28   :  { %s2097_s20 = scalar_lea.hbm %s2667_s0, 256 }
  0x29   :  { %p2098_p2 = scmp.ne.s32.totalorder %s2667_s0, %s2097_s20  ;;  %p2101_p3 = scmp.lt.u32.totalorder %s2097_s20, %s2667_s0 }
  0x2b   :  { %p2103_p4 = pnand %p2101_p3, %p2098_p2 }
  0x2d   :  { %2106 = shalt.err (!%p2103_p4)
}
  0x2e   :  { %s2107_s3 = scalar_lea.vmem %s27_s15, 256  ;;  %p2112_p6 = scmp.lt.s32.totalorder %s27_s15, %s27_s15 }
  0x2f   :  { %p2108_p5 = scmp.ne.s32.totalorder %s27_s15, %s2107_s3  ;;  %p2113_p7 = scmp.lt.s32.totalorder %s2107_s3, %s2107_s3 }
  0x31   :  { %p2114_p8 = por %p2113_p7, %p2112_p6 }
  0x33   :  { %p2115_p9 = pnand %p2114_p8, %p2108_p5 }
  0x35   :  { %2118 = shalt.err (!%p2115_p9)
}
  0x36   :  { %32 = dma.hbm_to_vmem [thread:$0]  %s2667_s0, 256, %s27_s15, [#allocation3], %s2243_s21, %s2243_s21, %s2244_s22  }
  0x37   :  { %s2119_s30 = scalar_lea.hbm %s2669_s2, 256 }
  0x38   :  { %p2120_p10 = scmp.ne.s32.totalorder %s2669_s2, %s2119_s30  ;;  %p2123_p11 = scmp.lt.u32.totalorder %s2119_s30, %s2669_s2 }
  0x3a   :  { %p2125_p12 = pnand %p2123_p11, %p2120_p10 }
  0x3c   :  { %2128 = shalt.err (!%p2125_p12)
}
  0x3d   :  { %s2129_s14 = scalar_lea.vmem %s2347_s17, 256  ;;  %p2134_p0 = scmp.lt.s32.totalorder %s2347_s17, %s2347_s17 }
  0x3e   :  { %p2130_p13 = scmp.ne.s32.totalorder %s2347_s17, %s2129_s14  ;;  %p2135_p1 = scmp.lt.s32.totalorder %s2129_s14, %s2129_s14 }
  0x40   :  { %p2136_p2 = por %p2135_p1, %p2134_p0 }
  0x42   :  { %p2137_p3 = pnand %p2136_p2, %p2130_p13 }
  0x44   :  { %2140 = shalt.err (!%p2137_p3)
}
  0x45   :  { %56 = dma.hbm_to_vmem [thread:$0]  %s2669_s2, 256, %s2347_s17, [#allocation6], %s2243_s21, %s2243_s21, %s2244_s22  }
  0x46   :  { %s2247_s16 = smov [#allocation10]   ;;  %s2248_s19 = smov [#allocation11]  }
  0x47   :  { %s74_s18 = sshll.u32 %s2247_s16, 4  ;;  %s88_s20 = sshll.u32 %s2248_s19, 4  ;;  %s75_s18 = int_to_ptr.vmem [resolvable:$true] %s74_s18  ;;  %s2384_s20 = int_to_ptr.vmem [resolvable:$true] %s88_s20 }
  0x48   :  { %s2141_s25 = scalar_lea.hbm %s2671_s4, 512 }
  0x49   :  { %p2142_p4 = scmp.ne.s32.totalorder %s2671_s4, %s2141_s25  ;;  %p2145_p5 = scmp.lt.u32.totalorder %s2141_s25, %s2671_s4 }
  0x4b   :  { %p2147_p6 = pnand %p2145_p5, %p2142_p4 }
  0x4d   :  { %2150 = shalt.err (!%p2147_p6)
}
  0x4e   :  { %s2151_s2 = scalar_lea.vmem %s75_s18, 512  ;;  %p2156_p8 = scmp.lt.s32.totalorder %s75_s18, %s75_s18 }
  0x4f   :  { %p2152_p7 = scmp.ne.s32.totalorder %s75_s18, %s2151_s2  ;;  %p2157_p9 = scmp.lt.s32.totalorder %s2151_s2, %s2151_s2 }
  0x51   :  { %p2158_p10 = por %p2157_p9, %p2156_p8 }
  0x53   :  { %p2159_p11 = pnand %p2158_p10, %p2152_p7 }
  0x55   :  { %2162 = shalt.err (!%p2159_p11)
}
  0x56   :  { %80 = dma.hbm_to_vmem [thread:$0]  %s2671_s4, 512, %s75_s18, [#allocation9], %s2243_s21, %s2243_s21, %s2244_s22  }
  0x57   :  { %s2163_s11 = scalar_lea.hbm %s2673_s6, 512 }
  0x58   :  { %p2164_p12 = scmp.ne.s32.totalorder %s2673_s6, %s2163_s11  ;;  %p2167_p13 = scmp.lt.u32.totalorder %s2163_s11, %s2673_s6 }
  0x5a   :  { %p2169_p0 = pnand %p2167_p13, %p2164_p12 }
  0x5c   :  { %2172 = shalt.err (!%p2169_p0)
}
  0x5d   :  { %s2173_s0 = scalar_lea.vmem %s2384_s20, 512  ;;  %p2178_p2 = scmp.lt.s32.totalorder %s2384_s20, %s2384_s20 }
  0x5e   :  { %p2174_p1 = scmp.ne.s32.totalorder %s2384_s20, %s2173_s0  ;;  %p2179_p3 = scmp.lt.s32.totalorder %s2173_s0, %s2173_s0 }
  0x60   :  { %p2180_p4 = por %p2179_p3, %p2178_p2 }
  0x62   :  { %p2181_p5 = pnand %p2180_p4, %p2174_p1 }
  0x64   :  { %2184 = shalt.err (!%p2181_p5)
}
  0x65   :  { %94 = dma.hbm_to_vmem [thread:$0]  %s2673_s6, 512, %s2384_s20, [#allocation12], %s2243_s21, %s2243_s21, %s2244_s22  }
  0x66   :  { %2229 = dma.done.wait [#allocation3], 256  }
  0x67   :  { %2230 = vsyncadd [#allocation3], 4294967040 }
  0x68   :  { %2231 = dma.done.wait [#allocation6], 512  }
  0x69   :  { %2232 = vsyncadd [#allocation6], 4294966784 }
  0x6a   :  { %2233 = dma.done.wait [#allocation9], 768  }
  0x6b   :  { %2234 = vsyncadd [#allocation9], 4294966528 }
  0x6c   :  { %2235 = dma.done.wait [#allocation12], 512  }
  0x6d   :  { %2236 = vsyncadd [#allocation12], 4294966784  ;;  %vm132_vm0 = vcmask 261120   ;;  %v121_v0 = vld [vmem:[#allocation10] sm:$0xff]  ;;  %v122_v1 = vld [vmem:[#allocation10 + $0x8] sm:$0xff]  ;;  %v2249_v13 = vmov 0.0   ;;  %v915_v44 = vlaneseq }
  0x6e   :  { %v123_v2 = vld [vmem:[#allocation10 + $0x10] sm:$0xff]  ;;  %v1986_v3 = vpack.c.bf16 %v122_v1, %v121_v0  ;;  %v124_v4 = vld [vmem:[#allocation10 + $0x18] sm:$0xff]  ;;  %v115_v5 = vld [vmem:[#allocation2] sm:$0xff]  ;;  %1895 = vmatprep.subr.mxu1 %v2249_v13  ;;  %s2250_s18 = smov 104   ;;  %s2251_s19 = smov 120   ;;  %vm2252_vm1 = vmmov 0  }
  0x6f   :  { %v1990_v6 = vpack.c.bf16 %v124_v4, %v123_v2  ;;  %1886 = vmatprep.mubr.msk.f32.mxu0 %vm132_vm0, %v115_v5  ;;  %v116_v7 = vld [vmem:[#allocation2 + $0x8] sm:$0xff]  ;;  %v117_v8 = vld [vmem:[#allocation5] sm:$0xff]  ;;  %v118_v9 = vld [vmem:[#allocation5 + $0x8] sm:$0xff]  ;;  %1897 = vmatprep.mubr.msk.f32.mxu1 %vm2252_vm1, %v2249_v13  ;;  %s2253_s20 = smov 112   ;;  %vm290_vm2 = vcmask 64512   ;;  %v916_v45 = vshrl.u32 %v915_v44, 7 }
  0x70   :  { %1987 = vmatprep.subr.bf16.mxu0 %v1986_v3  ;;  %v2430_v14 = vld [vmem:[%s2672_s5] ss:$0 sm:$0xff]  ;;  %s2254_s5 = smov 96   ;;  %v120_v20 = vld [vmem:[#allocation7 + $0x8] sm:$0xff]  ;;  %v918_v46 = vand.u32 127, %v915_v44  ;;  %v905_v48 = vld [vmem:[#allocation8] sm:$0xff] }
  0x71   :  { %1989 = vmatpush3.bf16.msra.mxu0 %v1986_v3  ;;  %v119_v19 = vld [vmem:[#allocation7] sm:$0xff]  ;;  %v906_v3 = vld [vmem:[#allocation8 + $0x8] sm:$0xff]  ;;  %s2255_s23 = smov 64   ;;  %s2256_s24 = smov 16   ;;  %vm1652_vm4 = vcmask 130048   ;;  %vm1655_vm5 = vcmask 195584  }
  0x72   :  { %1991 = vmatprep.subr.bf16.mxu0 %v1990_v6  ;;  %vm2506_vm3 = vcmp.gt.s32.totalorder %v918_v46, %v916_v45  ;;  %s2257_s25 = smov 24   ;;  %s2258_s26 = smov [#allocation14]  }
  0x73   :  { %s1777_s3 = sshll.u32 %s2258_s26, 4  ;;  %s1778_s3 = int_to_ptr.vmem [resolvable:$true] %s1777_s3 }
  0x74   :  { %s2185_s12 = scalar_lea.vmem %s1778_s3, 1024  ;;  %p2190_p7 = scmp.lt.s32.totalorder %s1778_s3, %s1778_s3 }
  0x75   :  { %1993 = vmatpush3.bf16.msra.mxu0 %v1990_v6  ;;  %p2186_p6 = scmp.ne.s32.totalorder %s1778_s3, %s2185_s12  ;;  %p2191_p8 = scmp.lt.s32.totalorder %s2185_s12, %s2185_s12 }
  0x76   :  { %1925 = vmatprep.subr.mxu0 %v2249_v13 }
  0x77   :  { %p2192_p9 = por %p2191_p8, %p2190_p7 }
  0x78   :  { %1887 = vmatmul.mubr.msk.f32.vlgmr.msra.gmra.mrb[0].mxu0 %vm132_vm0, %v116_v7 }
  0x79   :  { %1889 = vmatprep.mubr.msk.f32.mxu0 %vm132_vm0, %v117_v8  ;;  %p2193_p10 = pnand %p2192_p9, %p2186_p6 }
  0x7c   :  { %1890 = vmatmul.mubr.msk.f32.gmra.mrb[2].mxu0 %vm132_vm0, %v118_v9 }
  0x7d   :  { %1892 = vmatprep.mubr.msk.f32.mxu0 %vm132_vm0, %v119_v19 }
  0x80   :  { %1893 = vmatmul.mubr.msk.f32.gmra.mrb[4].mxu0 %vm132_vm0, %v120_v20 }
  0x81   :  { %1927 = vmatprep.mubr.msk.f32.mxu0 %vm2252_vm1, %v2249_v13 }
 0x14b   :  { %v1888_v10 = vpop.f32.mrb[0].mxu0 }
 0x14c   :  { %v217_v11 = vpop.f32.mrb[1].mxu0  ;;  %v223_v26 = vadd.f32 %v1888_v10, %v2430_v14 }
 0x14d   :  { %v218_v18 = vadd.f32 %v2430_v14, %v217_v11 }
 0x14f   :  { %v1891_v12 = vpop.f32.mrb[2].mxu0 }
 0x150   :  { %v227_v15 = vpop.f32.mrb[3].mxu0  ;;  %v233_v17 = vadd.f32 %v1891_v12, %v2430_v14 }
 0x151   :  { %v228_v16 = vadd.f32 %v2430_v14, %v227_v15 }
 0x153   :  { %270 = vrot.lane.b32.xlu1 %v228_v16, %s2250_s18  ;;  %262 = vrot.lane.b32.xlu0 %v228_v16, %s2251_s19  ;;  %v2502_v42 = vpop.f32.mrb[4].mxu0 }
 0x154   :  { %v2504_v43 = vpop.f32.mrb[5].mxu0 }
 0x157   :  { %264 = vrot.lane.b32.xlu1 %v233_v17, %s2251_s19  ;;  %266 = vrot.lane.b32.xlu0 %v228_v16, %s2253_s20 }
 0x15b   :  { %272 = vrot.lane.b32.xlu1 %v233_v17, %s2250_s18  ;;  %268 = vrot.lane.b32.xlu0 %v233_v17, %s2253_s20 }
 0x15f   :  { %288 = vrot.lane.b32.xlu0 %v228_v16, %s2254_s5 }
 0x163   :  { %248 = vrot.lane.b32.xlu0 %v218_v18, %s2251_s19 }
 0x167   :  { %252 = vrot.lane.b32.xlu0 %v218_v18, %s2253_s20 }
 0x16b   :  { %256 = vrot.lane.b32.xlu0 %v218_v18, %s2250_s18 }
 0x1c5   :  { %v271_v21 = vpop.permute.xlu1 %270  ;;  %v263_v22 = vpop.permute.xlu0 %262 }
 0x1c6   :  { %365 = vrot.lane.b32.xlu1 %v263_v22, %s2254_s5 }
 0x1c9   :  { %v265_v23 = vpop.permute.xlu1 %264  ;;  %v267_v24 = vpop.permute.xlu0 %266 }
 0x1ca   :  { %441 = vrot.lane.b32.xlu1 %v267_v24, %s2254_s5  ;;  %669 = vrot.lane.b32.xlu0 %v265_v23, %s2254_s5 }
 0x1cd   :  { %v269_v25 = vpop.permute.xlu0 %268  ;;  %v273_v28 = vpop.permute.xlu1 %272 }
 0x1ce   :  { %517 = vrot.lane.b32.xlu1 %v271_v21, %s2254_s5  ;;  %745 = vrot.lane.b32.xlu0 %v269_v25, %s2254_s5 }
 0x1d1   :  { %v289_v27 = vpop.permute.xlu0 %288 }
 0x1d2   :  { %593 = vrot.lane.b32.xlu1 %v233_v17, %s2254_s5  ;;  %1896 = vmatpush3.xpose.msk.msra.mxu1 %vm290_vm2, %v289_v27 }
 0x1d3   :  { %254 = vrot.lane.b32.xlu0 %v223_v26, %s2253_s20  ;;  %1900 = vmatprep.subr.mxu1 %v2249_v13 }
 0x1d5   :  { %1898 = vmatmul.mubr.msk.f32.vlgmr.msra.gmra.mrb[0].mxu1 %vm290_vm2, %v218_v18  ;;  %v249_v29 = vpop.permute.xlu0 %248 }
 0x1d6   :  { %250 = vrot.lane.b32.xlu1 %v223_v26, %s2251_s19  ;;  %1902 = vmatprep.mubr.msk.f32.mxu1 %vm2252_vm1, %v2249_v13 }
 0x1d9   :  { %v253_v30 = vpop.permute.xlu0 %252 }
 0x1da   :  { %821 = vrot.lane.b32.xlu1 %v273_v28, %s2254_s5 }
 0x1dd   :  { %v257_v31 = vpop.permute.xlu0 %256 }
 0x1de   :  { %258 = vrot.lane.b32.xlu1 %v223_v26, %s2250_s18 }
 0x238   :  { %v366_v32 = vpop.permute.xlu1 %365 }
 0x239   :  { %1901 = vmatpush3.xpose.msk.msra.mxu1 %vm290_vm2, %v366_v32 }
 0x23a   :  { %1905 = vmatprep.subr.mxu1 %v2249_v13 }
 0x23c   :  { %v442_v33 = vpop.permute.xlu1 %441  ;;  %v670_v34 = vpop.permute.xlu0 %669  ;;  %1903 = vmatmul.mubr.msk.f32.vlgmr.msra.gmra.mrb[2].mxu1 %vm290_vm2, %v249_v29 }
 0x23d   :  { %1906 = vmatpush3.xpose.msk.msra.mxu1 %vm290_vm2, %v442_v33  ;;  %1907 = vmatprep.mubr.msk.f32.mxu1 %vm2252_vm1, %v2249_v13 }
 0x23e   :  { %1910 = vmatprep.subr.mxu1 %v2249_v13 }
 0x240   :  { %v518_v35 = vpop.permute.xlu1 %517  ;;  %v746_v36 = vpop.permute.xlu0 %745  ;;  %1908 = vmatmul.mubr.msk.f32.vlgmr.msra.gmra.mrb[4].mxu1 %vm290_vm2, %v253_v30 }
 0x241   :  { %1911 = vmatpush3.xpose.msk.msra.mxu1 %vm290_vm2, %v518_v35  ;;  %1926 = vmatpush3.xpose.msk.msra.mxu0 %vm290_vm2, %v746_v36  ;;  %v238_v36 = vadd.f32 %v2430_v14, %v2504_v43 }
 0x242   :  { %1912 = vmatprep.mubr.msk.f32.mxu1 %vm2252_vm1, %v2249_v13  ;;  %1915 = vmatprep.subr.mxu1 %v2249_v13 }
 0x243   :  { %1935 = vmatprep.subr.mxu0 %v2249_v13 }
 0x244   :  { %v594_v37 = vpop.permute.xlu1 %593  ;;  %1913 = vmatmul.mubr.msk.f32.vlgmr.msra.gmra.mrb[6].mxu1 %vm290_vm2, %v257_v31 }
 0x245   :  { %v255_v38 = vpop.permute.xlu0 %254  ;;  %1916 = vmatpush3.xpose.msk.msra.mxu1 %vm290_vm2, %v594_v37  ;;  %1917 = vmatprep.mubr.msk.f32.mxu1 %vm2252_vm1, %v2249_v13  ;;  %v243_v37 = vadd.f32 %v2502_v42, %v2430_v14 }
 0x246   :  { %1928 = vmatmul.mubr.msk.f32.vlgmr.msra.gmra.mrb[6].mxu0 %vm290_vm2, %v255_v38  ;;  %1920 = vmatprep.subr.mxu1 %v2249_v13 }
 0x247   :  { %1937 = vmatprep.mubr.msk.f32.mxu0 %vm2252_vm1, %v2249_v13 }
 0x248   :  { %v251_v39 = vpop.permute.xlu1 %250  ;;  %1918 = vmatmul.mubr.msk.f32.vlgmr.msra.gmra.mrb[8].mxu1 %vm290_vm2, %v223_v26 }
 0x249   :  { %1921 = vmatpush3.xpose.msk.msra.mxu1 %vm290_vm2, %v670_v34  ;;  %1922 = vmatprep.mubr.msk.f32.mxu1 %vm2252_vm1, %v2249_v13 }
 0x24a   :  { %1930 = vmatprep.subr.mxu1 %v2249_v13 }
 0x24c   :  { %v822_v40 = vpop.permute.xlu1 %821  ;;  %1923 = vmatmul.mubr.msk.f32.vlgmr.msra.gmra.mrb[10].mxu1 %vm290_vm2, %v251_v39 }
 0x24d   :  { %1931 = vmatpush3.xpose.msk.msra.mxu1 %vm290_vm2, %v822_v40  ;;  %1932 = vmatprep.mubr.msk.f32.mxu1 %vm2252_vm1, %v2249_v13 }
 0x24e   :  { %1940 = vmatprep.subr.mxu1 %v2249_v13 }
 0x250   :  { %v259_v41 = vpop.permute.xlu1 %258 }
 0x251   :  { %1933 = vmatmul.mubr.msk.f32.vlgmr.msra.gmra.mrb[12].mxu1 %vm290_vm2, %v259_v41 }
 0x252   :  { %1942 = vmatprep.mubr.msk.f32.mxu1 %vm2252_vm1, %v2249_v13 }
 0x2a8   :  { %v361_v47 = vpop.f32.mrb[0].mxu1 }
 0x2a9   :  { %v897_v49 = vmul.f32 0.35355338, %v361_v47  ;;  %v1899_v50 = vpop.f32.mrb[1].mxu1 }
 0x2ab   :  { %v907_v52 = vadd.f32 %v905_v48, %v897_v49 }
 0x2ad   :  { %v2512_v53 = vsel %vm2506_vm3, -10000.0, %v907_v52 }
 0x2ae   :  { %v930_v54 = vsel %vm290_vm2, %v2512_v53, -inf }
 0x2af   :  { %931 = vmax.xlane.f32.xlu0 %v930_v54 }
 0x30f   :  { %v437_v55 = vpop.f32.mrb[2].mxu1 }
 0x310   :  { %v1904_v56 = vpop.f32.mrb[3].mxu1  ;;  %v898_v62 = vmul.f32 0.35355338, %v437_v55 }
 0x312   :  { %v908_v9 = vadd.f32 %v905_v48, %v898_v62 }
 0x313   :  { %v513_v57 = vpop.f32.mrb[4].mxu1 }
 0x314   :  { %v899_v58 = vmul.f32 0.35355338, %v513_v57  ;;  %v1909_v59 = vpop.f32.mrb[5].mxu1  ;;  %v2536_v23 = vsel %vm2506_vm3, -10000.0, %v908_v9 }
 0x315   :  { %v933_v25 = vsel %vm290_vm2, %v2536_v23, -inf }
 0x316   :  { %v909_v60 = vadd.f32 %v905_v48, %v899_v58 }
 0x317   :  { %v589_v61 = vpop.f32.mrb[6].mxu1 }
 0x318   :  { %v900_v63 = vmul.f32 0.35355338, %v589_v61  ;;  %v1914_v0 = vpop.f32.mrb[7].mxu1  ;;  %v2518_v1 = vsel %vm2506_vm3, -10000.0, %v909_v60 }
 0x319   :  { %v817_v2 = vpop.f32.mrb[6].mxu0  ;;  %v936_v4 = vsel %vm290_vm2, %v2518_v1, -inf }
 0x31a   :  { %v910_v5 = vadd.f32 %v905_v48, %v900_v63  ;;  %v903_v6 = vmul.f32 0.35355338, %v817_v2  ;;  %v1929_v7 = vpop.f32.mrb[7].mxu0  ;;  %937 = vmax.xlane.f32.xlu0 %v936_v4 }
 0x31b   :  { %v665_v8 = vpop.f32.mrb[8].mxu1 }
 0x31c   :  { %v913_v10 = vadd.f32 %v906_v3, %v903_v6  ;;  %v901_v11 = vmul.f32 0.35355338, %v665_v8  ;;  %v1919_v12 = vpop.f32.mrb[9].mxu1  ;;  %v2524_v15 = vsel %vm2506_vm3, -10000.0, %v910_v5 }
 0x31d   :  { %v939_v16 = vsel %vm290_vm2, %v2524_v15, -inf }
 0x31e   :  { %940 = vmax.xlane.f32.xlu0 %v939_v16  ;;  %v2530_v17 = vsel %vm2506_vm3, -10000.0, %v913_v10  ;;  %v911_v20 = vadd.f32 %v906_v3, %v901_v11 }
 0x31f   :  { %v948_v18 = vsel %vm290_vm2, %v2530_v17, -inf  ;;  %v741_v19 = vpop.f32.mrb[10].mxu1 }
 0x320   :  { %949 = vmax.xlane.f32.xlu1 %v948_v18  ;;  %v902_v21 = vmul.f32 0.35355338, %v741_v19  ;;  %v1924_v22 = vpop.f32.mrb[11].mxu1  ;;  %v2544_v28 = vsel %vm2506_vm3, -10000.0, %v911_v20 }
 0x321   :  { %v942_v33 = vsel %vm290_vm2, %v2544_v28, -inf }
 0x322   :  { %v912_v24 = vadd.f32 %v906_v3, %v902_v21 }
 0x324   :  { %934 = vmax.xlane.f32.xlu1 %v933_v25  ;;  %v893_v26 = vpop.f32.mrb[12].mxu1  ;;  %v927_v27 = vsel %vm2506_vm3, -10000.0, %v912_v24 }
 0x325   :  { %v904_v29 = vmul.f32 0.35355338, %v893_v26  ;;  %v1934_v30 = vpop.f32.mrb[13].mxu1  ;;  %v945_v31 = vsel %vm290_vm2, %v927_v27, -inf }
 0x326   :  { %946 = vmax.xlane.f32.xlu0 %v945_v31 }
 0x327   :  { %v914_v32 = vadd.f32 %v906_v3, %v904_v29 }
 0x328   :  { %943 = vmax.xlane.f32.xlu1 %v942_v33 }
 0x329   :  { %v929_v34 = vsel %vm2506_vm3, -10000.0, %v914_v32 }
 0x32a   :  { %v951_v35 = vsel %vm290_vm2, %v929_v34, -inf }
 0x32b   :  { %952 = vmax.xlane.f32.xlu0 %v951_v35 }
 0x339   :  { %276 = vrot.lane.b32.xlu1 %v238_v36, %s2251_s19 }
 0x33c   :  { %v932_v38 = vpop.xlane.xlu0 %931 }
 0x33d   :  { %284 = vrot.lane.b32.xlu1 %v238_v36, %s2250_s18  ;;  %v954_v50 = vsub.f32 %v2512_v53, %v932_v38 }
 0x33f   :  { %v962_v52 = vmul.f32 1.442695, %v954_v50 }
 0x341   :  { %278 = vrot.lane.b32.xlu1 %v243_v37, %s2251_s19  ;;  %280 = vrot.lane.b32.xlu0 %v238_v36, %s2253_s20  ;;  %2021 = vpow2.f32 %v962_v52 }
 0x345   :  { %286 = vrot.lane.b32.xlu1 %v243_v37, %s2250_s18  ;;  %282 = vrot.lane.b32.xlu0 %v243_v37, %s2253_s20 }
 0x349   :  { %1018 = vrot.lane.b32.xlu1 %v238_v36, %s2255_s23 }
 0x34b   :  { %v2022_v63 = vpop.eup %2021 }
 0x34c   :  { %v978_v3 = vsel %vm290_vm2, %v2022_v63, 0.0 }
 0x3a7   :  { %v938_v39 = vpop.xlane.xlu0 %937 }
 0x3a8   :  { %v956_v54 = vsub.f32 %v2518_v1, %v938_v39 }
 0x3aa   :  { %v966_v55 = vmul.f32 1.442695, %v956_v54 }
 0x3ab   :  { %v941_v41 = vpop.xlane.xlu0 %940 }
 0x3ac   :  { %v957_v56 = vsub.f32 %v2524_v15, %v941_v41  ;;  %2023 = vpow2.f32 %v966_v55 }
 0x3ad   :  { %v950_v40 = vpop.xlane.xlu1 %949 }
 0x3ae   :  { %v960_v57 = vsub.f32 %v2530_v17, %v950_v40  ;;  %v968_v58 = vmul.f32 1.442695, %v957_v56 }
 0x3b0   :  { %v974_v60 = vmul.f32 1.442695, %v960_v57  ;;  %2025 = vpow2.f32 %v968_v58  ;;  %v1658_v57 = vld [vmem:[#allocation11] sm:$0xff]  ;;  %v1659_v58 = vld [vmem:[#allocation11 + $0x8] sm:$0xff] }
 0x3b1   :  { %v935_v43 = vpop.xlane.xlu1 %934 }
 0x3b2   :  { %v955_v61 = vsub.f32 %v2536_v23, %v935_v43  ;;  %2027 = vpow2.f32 %v974_v60  ;;  %v1660_v60 = vld [vmem:[#allocation11 + $0x10] sm:$0xff] }
 0x3b3   :  { %v947_v44 = vpop.xlane.xlu0 %946 }
 0x3b4   :  { %v959_v59 = vsub.f32 %v927_v27, %v947_v44  ;;  %v964_v0 = vmul.f32 1.442695, %v955_v61  ;;  %v1661_v61 = vld [vmem:[#allocation11 + $0x18] sm:$0xff] }
 0x3b5   :  { %v944_v45 = vpop.xlane.xlu1 %943 }
 0x3b6   :  { %v972_v53 = vmul.f32 1.442695, %v959_v59  ;;  %v958_v1 = vsub.f32 %v2544_v28, %v944_v45  ;;  %v2024_v4 = vpop.eup %2023  ;;  %v1994_v59 = vpack.c.bf16 %v1659_v58, %v1658_v57 }
 0x3b7   :  { %v984_v6 = vsel %vm290_vm2, %v2024_v4, 0.0 }
 0x3b8   :  { %v953_v46 = vpop.xlane.xlu0 %952  ;;  %2029 = vpow2.f32 %v972_v53  ;;  %v970_v5 = vmul.f32 1.442695, %v958_v1 }
 0x3b9   :  { %v277_v14 = vpop.permute.xlu1 %276  ;;  %v961_v62 = vsub.f32 %v929_v34, %v953_v46  ;;  %2031 = vpow2.f32 %v964_v0 }
 0x3ba   :  { %1094 = vrot.lane.b32.xlu0 %v277_v14, %s2255_s23  ;;  %v2026_v7 = vpop.eup %2025 }
 0x3bb   :  { %v976_v2 = vmul.f32 1.442695, %v961_v62  ;;  %v987_v9 = vsel %vm290_vm2, %v2026_v7, 0.0  ;;  %v1998_v62 = vpack.c.bf16 %v1661_v61, %v1660_v60 }
 0x3bc   :  { %v281_v42 = vpop.permute.xlu0 %280  ;;  %v2577_v8 = vpop.eup %2027 }
 0x3bd   :  { %v285_v47 = vpop.permute.xlu1 %284  ;;  %1170 = vrot.lane.b32.xlu1 %v281_v42, %s2255_s23  ;;  %2033 = vpow2.f32 %v976_v2  ;;  %v996_v15 = vsel %vm290_vm2, %v2577_v8, 0.0 }
 0x3be   :  { %1322 = vrot.lane.b32.xlu0 %v243_v37, %s2255_s23  ;;  %2035 = vpow2.f32 %v970_v5 }
 0x3c0   :  { %v283_v21 = vpop.permute.xlu0 %282 }
 0x3c1   :  { %v279_v48 = vpop.permute.xlu1 %278  ;;  %1246 = vrot.lane.b32.xlu1 %v285_v47, %s2255_s23 }
 0x3c2   :  { %v2030_v10 = vpop.eup %2029 }
 0x3c3   :  { %v2580_v11 = vpop.eup %2031  ;;  %v993_v12 = vsel %vm290_vm2, %v2030_v10, 0.0 }
 0x3c4   :  { %v981_v18 = vsel %vm290_vm2, %v2580_v11, 0.0 }
 0x3c5   :  { %v287_v49 = vpop.permute.xlu1 %286  ;;  %1398 = vrot.lane.b32.xlu1 %v279_v48, %s2255_s23 }
 0x3c7   :  { %v2034_v16 = vpop.eup %2033 }
 0x3c8   :  { %v999_v17 = vsel %vm290_vm2, %v2034_v16, 0.0  ;;  %v2036_v19 = vpop.eup %2035 }
 0x3c9   :  { %v1019_v51 = vpop.permute.xlu1 %1018  ;;  %v990_v20 = vsel %vm290_vm2, %v2036_v19, 0.0 }
 0x3ca   :  { %1936 = vmatpush3.msra.mxu0 %v1019_v51 }
 0x3cb   :  { %1945 = vmatprep.subr.mxu0 %v2249_v13 }
 0x3dd   :  { %979 = vadd.xlane.f32.xlu0 %v978_v3 }
 0x3e1   :  { %985 = vadd.xlane.f32.xlu0 %v984_v6 }
 0x3e5   :  { %988 = vadd.xlane.f32.xlu0 %v987_v9 }
 0x3e9   :  { %994 = vadd.xlane.f32.xlu0 %v993_v12  ;;  %997 = vadd.xlane.f32.xlu1 %v996_v15 }
 0x3ed   :  { %1000 = vadd.xlane.f32.xlu0 %v999_v17  ;;  %982 = vadd.xlane.f32.xlu1 %v981_v18 }
 0x3f1   :  { %991 = vadd.xlane.f32.xlu1 %v990_v20 }
 0x402   :  { %1550 = vrot.lane.b32.xlu1 %v287_v49, %s2255_s23 }
 0x403   :  { %1474 = vrot.lane.b32.xlu0 %v283_v21, %s2255_s23 }
 0x42c   :  { %v1095_v22 = vpop.permute.xlu0 %1094 }
 0x42d   :  { %1941 = vmatpush3.msra.mxu1 %v1095_v22 }
 0x42e   :  { %1950 = vmatprep.subr.mxu1 %v2249_v13 }
 0x42f   :  { %v1171_v23 = vpop.permute.xlu1 %1170 }
 0x430   :  { %v1323_v24 = vpop.permute.xlu0 %1322 }
 0x433   :  { %v1247_v26 = vpop.permute.xlu1 %1246 }
 0x437   :  { %v1399_v28 = vpop.permute.xlu1 %1398 }
 0x46a   :  { %v980_v25 = vpop.xlane.xlu0 %979 }
 0x46b   :  { %2037 = vrcp.f32 %v980_v25 }
 0x46e   :  { %v986_v27 = vpop.xlane.xlu0 %985 }
 0x46f   :  { %2039 = vrcp.f32 %v986_v27 }
 0x472   :  { %v989_v29 = vpop.xlane.xlu0 %988 }
 0x473   :  { %2041 = vrcp.f32 %v989_v29 }
 0x475   :  { %v2038_v30 = vpop.eup %2037 }
 0x476   :  { %v1010_v31 = vmul.f32 %v2038_v30, %v2022_v63  ;;  %v995_v32 = vpop.xlane.xlu0 %994  ;;  %v998_v33 = vpop.xlane.xlu1 %997 }
 0x477   :  { %2043 = vrcp.f32 %v995_v32 }
 0x478   :  { %1752 = vst.msk [vmem:[#allocation14] sm:$0xff] %vm290_vm2, %v1010_v31  ;;  %2045 = vrcp.f32 %v998_v33  ;;  %1938 = vmatmul.mubr.msk.f32.vlgmr.msra.gmra.mrb[8].mxu0 %vm290_vm2, %v1010_v31 }
 0x479   :  { %v2040_v34 = vpop.eup %2039  ;;  %1946 = vmatpush3.msra.mxu0 %v1171_v23  ;;  %1947 = vmatprep.mubr.msk.f32.mxu0 %vm2252_vm1, %v2249_v13 }
 0x47a   :  { %v1012_v35 = vmul.f32 %v2040_v34, %v2024_v4  ;;  %v1001_v36 = vpop.xlane.xlu0 %1000  ;;  %v983_v37 = vpop.xlane.xlu1 %982  ;;  %1955 = vmatprep.subr.mxu0 %v2249_v13 }
 0x47b   :  { %2047 = vrcp.f32 %v1001_v36 }
 0x47c   :  { %1754 = vst.msk [vmem:[#allocation14 + $0x10] sm:$0xff] %vm290_vm2, %v1012_v35  ;;  %2049 = vrcp.f32 %v983_v37  ;;  %1948 = vmatmul.mubr.msk.f32.vlgmr.msra.gmra.mrb[10].mxu0 %vm290_vm2, %v1012_v35 }
 0x47d   :  { %v2042_v38 = vpop.eup %2041  ;;  %1956 = vmatpush3.msra.mxu0 %v1323_v24  ;;  %1957 = vmatprep.mubr.msk.f32.mxu0 %vm2252_vm1, %v2249_v13 }
 0x47e   :  { %v1013_v39 = vmul.f32 %v2042_v38, %v2026_v7  ;;  %v992_v40 = vpop.xlane.xlu1 %991  ;;  %1965 = vmatprep.subr.mxu0 %v2249_v13  ;;  %v1475_v50 = vpop.permute.xlu0 %1474 }
 0x47f   :  { %2051 = vrcp.f32 %v992_v40 }
 0x480   :  { %1755 = vst.msk [vmem:[#allocation14 + $0x18] sm:$0xff] %vm290_vm2, %v1013_v39 }
 0x481   :  { %v2044_v41 = vpop.eup %2043 }
 0x482   :  { %v2046_v43 = vpop.eup %2045  ;;  %v1015_v44 = vmul.f32 %v2044_v41, %v2030_v10  ;;  %v1551_v51 = vpop.permute.xlu1 %1550 }
 0x483   :  { %v1016_v45 = vmul.f32 %v2046_v43, %v2577_v8 }
 0x484   :  { %1757 = vst.msk [vmem:[#allocation14 + $0x28] sm:$0xff] %vm290_vm2, %v1015_v44 }
 0x485   :  { %v2048_v46 = vpop.eup %2047  ;;  %1758 = vst.msk [vmem:[#allocation14 + $0x30] sm:$0xff] %vm290_vm2, %v1016_v45 }
 0x486   :  { %v2050_v14 = vpop.eup %2049  ;;  %v1017_v42 = vmul.f32 %v2048_v46, %v2034_v16 }
 0x487   :  { %v1011_v47 = vmul.f32 %v2050_v14, %v2580_v11 }
 0x488   :  { %1759 = vst.msk [vmem:[#allocation14 + $0x38] sm:$0xff] %vm290_vm2, %v1017_v42 }
 0x489   :  { %v2052_v48 = vpop.eup %2051  ;;  %1753 = vst.msk [vmem:[#allocation14 + $0x8] sm:$0xff] %vm290_vm2, %v1011_v47  ;;  %1943 = vmatmul.mubr.msk.f32.vlgmr.msra.gmra.mrb[14].mxu1 %vm290_vm2, %v1011_v47 }
 0x48a   :  { %v1014_v49 = vmul.f32 %v2052_v48, %v2036_v19  ;;  %1951 = vmatpush3.msra.mxu1 %v1247_v26  ;;  %1952 = vmatprep.mubr.msk.f32.mxu1 %vm2252_vm1, %v2249_v13 }
 0x48b   :  { %1960 = vmatprep.subr.mxu1 %v2249_v13 }
 0x48c   :  { %1756 = vst.msk [vmem:[#allocation14 + $0x20] sm:$0xff] %vm290_vm2, %v1014_v49  ;;  %1958 = vmatmul.mubr.msk.f32.vlgmr.msra.gmra.mrb[12].mxu0 %vm290_vm2, %v1014_v49 }
 0x48d   :  { %1953 = vmatmul.mubr.msk.f32.vlgmr.msra.gmra.mrb[16].mxu1 %vm290_vm2, %v1013_v39  ;;  %1966 = vmatpush3.msra.mxu0 %v1475_v50 }
 0x48e   :  { %1961 = vmatpush3.msra.mxu1 %v1399_v28  ;;  %1962 = vmatprep.mubr.msk.f32.mxu1 %vm2252_vm1, %v2249_v13 }
 0x48f   :  { %1967 = vmatprep.mubr.msk.f32.mxu0 %vm2252_vm1, %v2249_v13  ;;  %1970 = vmatprep.subr.mxu1 %v2249_v13 }
 0x490   :  { %1968 = vmatmul.mubr.msk.f32.vlgmr.msra.gmra.mrb[14].mxu0 %vm290_vm2, %v1016_v45  ;;  %1995 = vmatprep.subr.bf16.mxu0 %v1994_v59 }
 0x491   :  { %1963 = vmatmul.mubr.msk.f32.vlgmr.msra.gmra.mrb[18].mxu1 %vm290_vm2, %v1015_v44  ;;  %1997 = vmatpush3.bf16.msra.mxu0 %v1994_v59 }
 0x492   :  { %1971 = vmatpush3.msra.mxu1 %v1551_v51  ;;  %1972 = vmatprep.mubr.msk.f32.mxu1 %vm2252_vm1, %v2249_v13 }
 0x493   :  { %1999 = vmatprep.subr.bf16.mxu0 %v1998_v62 }
 0x495   :  { %1973 = vmatmul.mubr.msk.f32.vlgmr.msra.gmra.mrb[20].mxu1 %vm290_vm2, %v1017_v42  ;;  %2001 = vmatpush3.bf16.msra.mxu0 %v1998_v62 }
 0x54b   :  { %v1090_v52 = vpop.f32.mrb[8].mxu0 }
 0x54c   :  { %v1939_v54 = vpop.f32.mrb[9].mxu0 }
 0x54f   :  { %v1242_v55 = vpop.f32.mrb[10].mxu0 }
 0x550   :  { %v1949_v56 = vpop.f32.mrb[11].mxu0 }
 0x55c   :  { %v1166_v53 = vpop.f32.mrb[14].mxu1 }
 0x55d   :  { %1628 = vrot.lane.b32.xlu0 %v1166_v53, %s2244_s22  ;;  %v1944_v63 = vpop.f32.mrb[15].mxu1 }
 0x55f   :  { %v1394_v13 = vpop.f32.mrb[12].mxu0 }
 0x560   :  { %v1318_v0 = vpop.f32.mrb[16].mxu1  ;;  %v1959_v1 = vpop.f32.mrb[13].mxu0 }
 0x561   :  { %1636 = vrot.lane.b32.xlu0 %v1242_v55, %s2256_s24  ;;  %v1954_v2 = vpop.f32.mrb[17].mxu1 }
 0x563   :  { %v1546_v3 = vpop.f32.mrb[14].mxu0 }
 0x564   :  { %v1470_v4 = vpop.f32.mrb[18].mxu1  ;;  %v1969_v5 = vpop.f32.mrb[15].mxu0 }
 0x565   :  { %1644 = vrot.lane.b32.xlu0 %v1318_v0, %s2257_s25  ;;  %1630 = vrot.lane.b32.xlu1 %v1470_v4, %s2244_s22  ;;  %v1964_v6 = vpop.f32.mrb[19].mxu1 }
 0x568   :  { %v1622_v7 = vpop.f32.mrb[20].mxu1 }
 0x569   :  { %1638 = vrot.lane.b32.xlu1 %v1546_v3, %s2256_s24  ;;  %v1974_v8 = vpop.f32.mrb[21].mxu1 }
 0x56d   :  { %1646 = vrot.lane.b32.xlu1 %v1622_v7, %s2257_s25 }
 0x5cf   :  { %v1629_v9 = vpop.permute.xlu0 %1628 }
 0x5d0   :  { %v1650_v11 = vsel %vm290_vm2, %v1090_v52, %v1629_v9 }
 0x5d3   :  { %v1637_v10 = vpop.permute.xlu0 %1636 }
 0x5d4   :  { %v1653_v12 = vsel %vm1652_vm4, %v1650_v11, %v1637_v10 }
 0x5d7   :  { %v1645_v15 = vpop.permute.xlu0 %1644  ;;  %v1631_v16 = vpop.permute.xlu1 %1630 }
 0x5d8   :  { %v1656_v17 = vsel %vm1655_vm5, %v1653_v12, %v1645_v15  ;;  %v1651_v19 = vsel %vm290_vm2, %v1394_v13, %v1631_v16 }
 0x5d9   :  { %1983 = vmatprep.mubr.msk.f32.mxu0 %vm132_vm0, %v1656_v17 }
 0x5db   :  { %v1639_v18 = vpop.permute.xlu1 %1638 }
 0x5dc   :  { %v1654_v20 = vsel %vm1652_vm4, %v1651_v19, %v1639_v18 }
 0x5df   :  { %v1647_v21 = vpop.permute.xlu1 %1646 }
 0x5e0   :  { %v1657_v22 = vsel %vm1655_vm5, %v1654_v20, %v1647_v21 }
 0x5e1   :  { %1984 = vmatmul.mubr.msk.f32.vlgmr.msra.gmra.mrb[16].mxu0 %vm132_vm0, %v1657_v22 }
 0x5e2   :  { %2196 = shalt.err (!%p2193_p10)
}
 0x5e3   :  { %s2197_s17 = scalar_lea.hbm %s2676_s9, 1024 }
 0x5e4   :  { %p2198_p11 = scmp.ne.s32.totalorder %s2676_s9, %s2197_s17  ;;  %p2201_p12 = scmp.lt.u32.totalorder %s2197_s17, %s2676_s9 }
 0x5e6   :  { %p2203_p13 = pnand %p2201_p12, %p2198_p11 }
 0x5e8   :  { %2206 = shalt.err (!%p2203_p13)
}
 0x5e9   :  { %1783 = dma.vmem_to_hbm [thread:$0]  %s1778_s3, 1024, %s2676_s9, [#allocation15], %s2243_s21, %s2243_s21, %s2244_s22  }
 0x5ea   :  { %v1827_v23 = vld [vmem:[%s2674_s7] ss:$0 sm:$0xff]  ;;  %s2259_s0 = smov [#allocation13]  }
 0x5eb   :  { %s1765_s4 = sshll.u32 %s2259_s0, 4  ;;  %s1766_s4 = int_to_ptr.vmem [resolvable:$true] %s1765_s4 }
 0x5ec   :  { %s2207_s15 = scalar_lea.vmem %s1766_s4, 256  ;;  %p2212_p1 = scmp.lt.s32.totalorder %s1766_s4, %s1766_s4 }
 0x5ed   :  { %p2208_p0 = scmp.ne.s32.totalorder %s1766_s4, %s2207_s15  ;;  %p2213_p2 = scmp.lt.s32.totalorder %s2207_s15, %s2207_s15 }
 0x5ef   :  { %p2214_p3 = por %p2213_p2, %p2212_p1 }
 0x5f1   :  { %p2215_p4 = pnand %p2214_p3, %p2208_p0 }
 0x6b4   :  { %v1985_v24 = vpop.f32.mrb[16].mxu0 }
 0x6b5   :  { %v1747_v25 = vadd.f32 %v1985_v24, %v1827_v23  ;;  %v1741_v26 = vpop.f32.mrb[17].mxu0 }
 0x6b6   :  { %v1742_v27 = vadd.f32 %v1827_v23, %v1741_v26 }
 0x6b7   :  { %1751 = vst.msk [vmem:[#allocation13 + $0x8] sm:$0xff] %vm132_vm0, %v1747_v25 }
 0x6b8   :  { %1750 = vst.msk [vmem:[#allocation13] sm:$0xff] %vm132_vm0, %v1742_v27 }
 0x6b9   :  { %2218 = shalt.err (!%p2215_p4)
}
 0x6ba   :  { %s2219_s6 = scalar_lea.hbm %s2675_s8, 256 }
 0x6bb   :  { %p2220_p5 = scmp.ne.s32.totalorder %s2675_s8, %s2219_s6  ;;  %p2223_p6 = scmp.lt.u32.totalorder %s2219_s6, %s2675_s8 }
 0x6bd   :  { %p2225_p7 = pnand %p2223_p6, %p2220_p5 }
 0x6bf   :  { %2228 = shalt.err (!%p2225_p7)
}
 0x6c0   :  { %1771 = dma.vmem_to_hbm [thread:$0]  %s1766_s4, 256, %s2675_s8, [#allocation4], %s2243_s21, %s2243_s21, %s2244_s22  }
 0x6c1   :  { %2237 = dma.done.wait [#allocation4], 256  }
 0x6c2   :  { %2238 = vsyncadd [#allocation4], 4294967040 }
 0x6c3   :  { %2239 = dma.done.wait [#allocation15], 1024  }
 0x6c4   :  { %2240 = vsyncadd [#allocation15], 4294966272 }
 0x6c5   :  { %1790 = vsyncpa [#allocation3], 1 }
 0x6c6   :  { %1791 = vsyncpa [#allocation6], 1 }
 0x6c7   :  { %1792 = vsyncpa [#allocation9], 1 }
 0x6c8   :  { %1793 = vsyncpa [#allocation12], 1 }
 0x6c9   :  { %1794 = vsyncpa [#allocation4], 1 }
 0x6ca   :  { %1795 = vsyncpa [#allocation15], 1 }

</bundles_post_ra>
